<compile_context>
chip_gen: v7x
topology: tpu7x:2x2x1
jax: 0.10.0
libtpu: 0.0.40
codegen_flags: <defaults>
</compile_context>

<pallas_src>
import jax
import jax.numpy as jnp
from jax.experimental import pallas as pl
from jax.experimental.pallas import tpu as pltpu


def _round_up(x, m):
    return ((x + m - 1) // m) * m


def _discriminator_kernel(x_ref, w1_ref, b1_ref, w2_ref, b2_ref,
                          rep_ref, logits_ref, probs_ref):
    # Dropouts (input + per-layer) are identity in eval mode.
    x = x_ref[...]

    # Hidden layer: Linear + LeakyReLU(0.2).
    h = jnp.dot(x, w1_ref[...], preferred_element_type=jnp.float32) + b1_ref[...]
    h = jnp.where(h > 0, h, 0.2 * h)          # LeakyReLU(negative_slope=0.2)
    rep_ref[...] = h.astype(rep_ref.dtype)

    # Logit layer + sigmoid (sigmoid kept in-kernel: EUP slot, ~free).
    logits = jnp.dot(h, w2_ref[...], preferred_element_type=jnp.float32) + b2_ref[...]
    logits_ref[...] = logits.astype(logits_ref.dtype)
    probs_ref[...] = jax.nn.sigmoid(logits).astype(probs_ref.dtype)


def discriminator_forward(x, w1, b1, w2, b2, *, batch_tile=256):
    """Eval-mode forward pass.

    x:  [B, D_in]   input representations
    w1: [D_in, H]   hidden Linear weight (transposed from PyTorch [out, in])
    b1: [1, H]
    w2: [H, C]      logit Linear weight (C = num_labels + 1)
    b2: [1, C]
    Returns (last_rep [B,H], logits [B,C], probs [B,C]), float32.
    """
    B, D = x.shape
    H = w1.shape[1]
    C = w2.shape[1]

    # Pad feature dims to full 128-lane width (zero padding is exact: padded
    # K-columns contribute 0 to the dot, padded N-columns/bias are 0 and get
    # sliced off after the call).
    Dp = _round_up(D, 128)
    Hp = _round_up(H, 128)
    Cp = _round_up(C, 128)

    # Batch tile: large enough to amortize per-grid-step overhead, but never
    # larger than the (8-aligned) batch itself. VMEM footprint per tile is
    # tiny (few hundred KiB) -> safe on v7x's smaller VMEM too.
    TB = min(batch_tile, _round_up(B, 8))
    Bp = _round_up(B, TB)
    n_tiles = Bp // TB

    f32 = jnp.float32
    xp = jnp.zeros((Bp, Dp), f32).at[:B, :D].set(x.astype(f32))
    w1p = jnp.zeros((Dp, Hp), f32).at[:D, :H].set(w1.astype(f32))
    b1p = jnp.zeros((1, Hp), f32).at[:, :H].set(b1.astype(f32))
    w2p = jnp.zeros((Hp, Cp), f32).at[:H, :C].set(w2.astype(f32))
    b2p = jnp.zeros((1, Cp), f32).at[:, :C].set(b2.astype(f32))

    out_shapes = (
        jax.ShapeDtypeStruct((Bp, Hp), f32),  # last_rep (padded)
        jax.ShapeDtypeStruct((Bp, Cp), f32),  # logits   (padded)
        jax.ShapeDtypeStruct((Bp, Cp), f32),  # probs    (padded)
    )

    batch_block = lambda cols: pl.BlockSpec((TB, cols), lambda i: (i, 0))
    resident = lambda shape: pl.BlockSpec(shape, lambda i: (0, 0))

    cost = pl.CostEstimate(
        flops=2 * Bp * (Dp * Hp + Hp * Cp),
        transcendentals=Bp * Cp,
        bytes_accessed=4 * (Bp * Dp + Dp * Hp + Hp + Hp * Cp + Cp
                            + Bp * Hp + 2 * Bp * Cp),
    )

    rep_p, logits_p, probs_p = pl.pallas_call(
        _discriminator_kernel,
        out_shape=out_shapes,
        grid=(n_tiles,),
        in_specs=[
            batch_block(Dp),       # x streams tile-by-tile along batch
            resident((Dp, Hp)),    # weights / biases stay resident
            resident((1, Hp)),
            resident((Hp, Cp)),
            resident((1, Cp)),
        ],
        out_specs=(
            batch_block(Hp),
            batch_block(Cp),
            batch_block(Cp),
        ),
        compiler_params=pltpu.CompilerParams(
            dimension_semantics=("parallel",),   # shard batch tiles across TCs
        ),
        cost_estimate=cost,
    )(xp, w1p, b1p, w2p, b2p)

    return rep_p[:B, :H], logits_p[:B, :C], probs_p[:B, :C]


if __name__ == "__main__":
    # Small shapes consistent with the module: Discriminator(input_size=32,
    # hidden_sizes=[32], num_labels=2) applied to a [batch=8, 32] input.
    B, D_IN, HID, NUM_LABELS = 8, 32, 32, 2
    C = NUM_LABELS + 1

    key = jax.random.PRNGKey(0)
    kx, k1, k2, k3, k4 = jax.random.split(key, 5)

    x = jax.random.normal(kx, (B, D_IN), dtype=jnp.float32)

    # Deterministic parameter init (uniform, PyTorch-Linear-style scaling).
    lim1 = 1.0 / (D_IN ** 0.5)
    w1 = jax.random.uniform(k1, (D_IN, HID), jnp.float32, -lim1, lim1)
    b1 = jax.random.uniform(k2, (1, HID), jnp.float32, -lim1, lim1)
    lim2 = 1.0 / (HID ** 0.5)
    w2 = jax.random.uniform(k3, (HID, C), jnp.float32, -lim2, lim2)
    b2 = jax.random.uniform(k4, (1, C), jnp.float32, -lim2, lim2)

    last_rep, logits, probs = discriminator_forward(x, w1, b1, w2, b2)
    jax.block_until_ready((last_rep, logits, probs))

    # Reference check in plain JAX.
    h_ref = x @ w1 + b1
    h_ref = jnp.where(h_ref > 0, h_ref, 0.2 * h_ref)
    logits_ref = h_ref @ w2 + b2
    probs_ref = jax.nn.sigmoid(logits_ref)
    assert last_rep.shape == (B, HID)
    assert logits.shape == (B, C)
    assert probs.shape == (B, C)
    assert jnp.allclose(last_rep, h_ref, atol=1e-5)
    assert jnp.allclose(logits, logits_ref, atol=1e-5)
    assert jnp.allclose(probs, probs_ref, atol=1e-5)

    print("KERNEL_OK")
</pallas_src>

<mosaic_0001>
module attributes {stable_mosaic.version = 11 : i64} {
  func.func @_discriminator_kernel(%arg0: i32, %arg1: memref<8x128xf32, #tpu.memory_space<vmem>>, %arg2: memref<128x128xf32, #tpu.memory_space<vmem>>, %arg3: memref<1x128xf32, #tpu.memory_space<vmem>>, %arg4: memref<128x128xf32, #tpu.memory_space<vmem>>, %arg5: memref<1x128xf32, #tpu.memory_space<vmem>>, %arg6: memref<8x128xf32, #tpu.memory_space<vmem>>, %arg7: memref<8x128xf32, #tpu.memory_space<vmem>>, %arg8: memref<8x128xf32, #tpu.memory_space<vmem>>) attributes {dimension_semantics = [#tpu.dimension_semantics<parallel>], iteration_bounds = array<i64: 1>, scalar_prefetch = 0 : i64, scratch_operands = 0 : i64, tpu.core_type = #tpu.core_type<tc>, window_params = [{transform_indices = @transform_0, window_bounds = array<i64: 8, 128>}, {pipeline_mode = #tpu.pipeline_mode<synchronous>, transform_indices = @transform_1, window_bounds = array<i64: 128, 128>}, {pipeline_mode = #tpu.pipeline_mode<synchronous>, transform_indices = @transform_2, window_bounds = array<i64: 1, 128>}, {pipeline_mode = #tpu.pipeline_mode<synchronous>, transform_indices = @transform_3, window_bounds = array<i64: 128, 128>}, {pipeline_mode = #tpu.pipeline_mode<synchronous>, transform_indices = @transform_4, window_bounds = array<i64: 1, 128>}, {transform_indices = @transform_5, window_bounds = array<i64: 8, 128>}, {transform_indices = @transform_6, window_bounds = array<i64: 8, 128>}, {transform_indices = @transform_7, window_bounds = array<i64: 8, 128>}]} {
    %c0 = arith.constant 0 : index
    %c0_0 = arith.constant 0 : index
    %0 = vector.load %arg1[%c0, %c0_0] : memref<8x128xf32, #tpu.memory_space<vmem>>, vector<8x128xf32>
    %c0_1 = arith.constant 0 : index
    %c0_2 = arith.constant 0 : index
    %1 = vector.load %arg2[%c0_1, %c0_2] : memref<128x128xf32, #tpu.memory_space<vmem>>, vector<128x128xf32>
    %cst = arith.constant dense<0.000000e+00> : vector<8x128xf32>
    %2 = tpu.matmul %0, %1, %cst {dimension_numbers = #tpu.dot_dimension_numbers<[1], [0], [0], [1], [0, 0, 1, 1], [], []>} : vector<8x128xf32>, vector<128x128xf32>, vector<8x128xf32> -> vector<8x128xf32>
    %c0_3 = arith.constant 0 : index
    %c0_4 = arith.constant 0 : index
    %3 = vector.load %arg3[%c0_3, %c0_4] : memref<1x128xf32, #tpu.memory_space<vmem>>, vector<1x128xf32>
    %4 = vector.broadcast %3 : vector<1x128xf32> to vector<8x128xf32>
    %5 = arith.addf %2, %4 : vector<8x128xf32>
    %cst_5 = arith.constant 0.000000e+00 : f32
    %6 = vector.broadcast %cst_5 : f32 to vector<8x128xf32>
    %7 = arith.cmpf ogt, %5, %6 : vector<8x128xf32>
    %cst_6 = arith.constant 2.000000e-01 : f32
    %8 = vector.broadcast %cst_6 : f32 to vector<8x128xf32>
    %9 = arith.mulf %8, %5 : vector<8x128xf32>
    %10 = arith.select %7, %5, %9 : vector<8x128xi1>, vector<8x128xf32>
    %c0_7 = arith.constant 0 : index
    %c0_8 = arith.constant 0 : index
    %11 = vector.load %arg6[%c0_7, %c0_8] : memref<8x128xf32, #tpu.memory_space<vmem>>, vector<8x128xf32>
    tpu.vector_store %arg6[%c0_7, %c0_8], %10 {strides = array<i32>} : memref<8x128xf32, #tpu.memory_space<vmem>>, vector<8x128xf32>,
    %c0_9 = arith.constant 0 : index
    %c0_10 = arith.constant 0 : index
    %12 = vector.load %arg4[%c0_9, %c0_10] : memref<128x128xf32, #tpu.memory_space<vmem>>, vector<128x128xf32>
    %cst_11 = arith.constant dense<0.000000e+00> : vector<8x128xf32>
    %13 = tpu.matmul %10, %12, %cst_11 {dimension_numbers = #tpu.dot_dimension_numbers<[1], [0], [0], [1], [0, 0, 1, 1], [], []>} : vector<8x128xf32>, vector<128x128xf32>, vector<8x128xf32> -> vector<8x128xf32>
    %c0_12 = arith.constant 0 : index
    %c0_13 = arith.constant 0 : index
    %14 = vector.load %arg5[%c0_12, %c0_13] : memref<1x128xf32, #tpu.memory_space<vmem>>, vector<1x128xf32>
    %15 = vector.broadcast %14 : vector<1x128xf32> to vector<8x128xf32>
    %16 = arith.addf %13, %15 : vector<8x128xf32>
    %c0_14 = arith.constant 0 : index
    %c0_15 = arith.constant 0 : index
    %17 = vector.load %arg7[%c0_14, %c0_15] : memref<8x128xf32, #tpu.memory_space<vmem>>, vector<8x128xf32>
    tpu.vector_store %arg7[%c0_14, %c0_15], %16 {strides = array<i32>} : memref<8x128xf32, #tpu.memory_space<vmem>>, vector<8x128xf32>,
    %18 = arith.negf %16 : vector<8x128xf32>
    %19 = math.exp %18 : vector<8x128xf32>
    %cst_16 = arith.constant 1.000000e+00 : f32
    %20 = vector.broadcast %cst_16 : f32 to vector<8x128xf32>
    %21 = arith.addf %20, %19 : vector<8x128xf32>
    %22 = arith.divf %20, %21 : vector<8x128xf32>
    %c0_17 = arith.constant 0 : index
    %c0_18 = arith.constant 0 : index
    %23 = vector.load %arg8[%c0_17, %c0_18] : memref<8x128xf32, #tpu.memory_space<vmem>>, vector<8x128xf32>
    tpu.vector_store %arg8[%c0_17, %c0_18], %22 {strides = array<i32>} : memref<8x128xf32, #tpu.memory_space<vmem>>, vector<8x128xf32>,
    return
  }
  func.func @transform_0(%arg0: i32) -> (i32, i32) {
    %c0_i32 = arith.constant 0 : i32
    %c0_i32_0 = arith.constant 0 : i32
    return %arg0, %c0_i32 : i32, i32
  }
  func.func @transform_1(%arg0: i32) -> (i32, i32) {
    %c0_i32 = arith.constant 0 : i32
    %c0_i32_0 = arith.constant 0 : i32
    %c0_i32_1 = arith.constant 0 : i32
    return %c0_i32, %c0_i32_0 : i32, i32
  }
  func.func @transform_2(%arg0: i32) -> (i32, i32) {
    %c0_i32 = arith.constant 0 : i32
    %c0_i32_0 = arith.constant 0 : i32
    %c0_i32_1 = arith.constant 0 : i32
    return %c0_i32, %c0_i32_0 : i32, i32
  }
  func.func @transform_3(%arg0: i32) -> (i32, i32) {
    %c0_i32 = arith.constant 0 : i32
    %c0_i32_0 = arith.constant 0 : i32
    %c0_i32_1 = arith.constant 0 : i32
    return %c0_i32, %c0_i32_0 : i32, i32
  }
  func.func @transform_4(%arg0: i32) -> (i32, i32) {
    %c0_i32 = arith.constant 0 : i32
    %c0_i32_0 = arith.constant 0 : i32
    %c0_i32_1 = arith.constant 0 : i32
    return %c0_i32, %c0_i32_0 : i32, i32
  }
  func.func @transform_5(%arg0: i32) -> (i32, i32) {
    %c0_i32 = arith.constant 0 : i32
    %c0_i32_0 = arith.constant 0 : i32
    return %arg0, %c0_i32 : i32, i32
  }
  func.func @transform_6(%arg0: i32) -> (i32, i32) {
    %c0_i32 = arith.constant 0 : i32
    %c0_i32_0 = arith.constant 0 : i32
    return %arg0, %c0_i32 : i32, i32
  }
  func.func @transform_7(%arg0: i32) -> (i32, i32) {
    %c0_i32 = arith.constant 0 : i32
    %c0_i32_0 = arith.constant 0 : i32
    return %arg0, %c0_i32 : i32, i32
  }
}

</mosaic_0001>

<bundles_post_ra>
// kernel: tpu_custom_call.1
= control target key start
LH: loop header
LB: loop body
LE: loop exit
PB: predicated region body
PF: predicated region fallthrough
CT: control target
= control target key end

     0   :  { %13 = vsyncpa [#allocation3], 0  ;;  %s767_s0 = inlined_call_operand.hbm [shape: f32[8,128], index: 0, kind: input, shape index: {}]   ;;  %s768_s1 = inlined_call_operand.hbm [shape: f32[128,128], index: 1, kind: input, shape index: {}]   ;;  %s769_s2 = inlined_call_operand.vmem [shape: f32[1,128], index: 2, kind: input, shape index: {}]   ;;  %s770_s3 = inlined_call_operand.hbm [shape: f32[128,128], index: 3, kind: input, shape index: {}]   ;;  %s771_s4 = inlined_call_operand.vmem [shape: f32[1,128], index: 4, kind: input, shape index: {}]   ;;  %s772_s5 = inlined_call_operand.hbm [shape: f32[8,128], index: 5, kind: output, shape index: {0}]   ;;  %s773_s6 = inlined_call_operand.hbm [shape: f32[8,128], index: 6, kind: output, shape index: {1}]   ;;  %s774_s7 = inlined_call_operand.hbm [shape: f32[8,128], index: 7, kind: output, shape index: {2}]  }
   0x1   :  { %14 = vsyncpa [#allocation6], 0 }
   0x2   :  { %15 = vsyncpa [#allocation4], 0 }
   0x3   :  { %16 = vsyncpa [#allocation10], 0  ;;  %s616_s24 = smov [#allocation5]   ;;  %s476_s28 = scalar_lea.hbm %s768_s1, 2048 }
   0x4   :  { %s32_s25 = sshll.u32 %s616_s24, 4  ;;  %p477_p0 = scmp.ne.s32.totalorder %s768_s1, %s476_s28  ;;  %s33_s25 = int_to_ptr.vmem [resolvable:$true] %s32_s25 }
   0x5   :  { %p480_p1 = scmp.lt.u32.totalorder %s476_s28, %s768_s1 }
   0x7   :  { %p482_p2 = pnand %p480_p1, %p477_p0 }
   0x9   :  { %485 = shalt.err (!%p482_p2)
}
   0xa   :  { %s486_s10 = scalar_lea.vmem %s33_s25, 2048  ;;  %p491_p4 = scmp.lt.s32.totalorder %s33_s25, %s33_s25 }
   0xb   :  { %p487_p3 = scmp.ne.s32.totalorder %s33_s25, %s486_s10  ;;  %p492_p5 = scmp.lt.s32.totalorder %s486_s10, %s486_s10 }
   0xd   :  { %p493_p6 = por %p492_p5, %p491_p4 }
   0xf   :  { %p494_p7 = pnand %p493_p6, %p487_p3 }
  0x11   :  { %497 = shalt.err (!%p494_p7)
}
  0x12   :  { %s617_s11 = smov 128   ;;  %s618_s12 = smov 8  }
  0x13   :  { %38 = dma.hbm_to_vmem [thread:$0]  %s768_s1, 2048, %s33_s25, [#allocation6], %s617_s11, %s617_s11, %s618_s12  }
  0x14   :  { %s619_s15 = smov [#allocation2]   ;;  %s620_s17 = smov [#allocation7]  }
  0x15   :  { %s23_s16 = sshll.u32 %s619_s15, 4  ;;  %s46_s18 = sshll.u32 %s620_s17, 4  ;;  %s24_s16 = int_to_ptr.vmem [resolvable:$true] %s23_s16  ;;  %s47_s18 = int_to_ptr.vmem [resolvable:$true] %s46_s18 }
  0x16   :  { %s498_s21 = scalar_lea.hbm %s767_s0, 128 }
  0x17   :  { %p499_p8 = scmp.ne.s32.totalorder %s767_s0, %s498_s21  ;;  %p502_p9 = scmp.lt.u32.totalorder %s498_s21, %s767_s0 }
  0x19   :  { %p504_p10 = pnand %p502_p9, %p499_p8 }
  0x1b   :  { %507 = shalt.err (!%p504_p10)
}
  0x1c   :  { %s508_s1 = scalar_lea.vmem %s24_s16, 128  ;;  %p513_p12 = scmp.lt.s32.totalorder %s24_s16, %s24_s16 }
  0x1d   :  { %p509_p11 = scmp.ne.s32.totalorder %s24_s16, %s508_s1  ;;  %p514_p13 = scmp.lt.s32.totalorder %s508_s1, %s508_s1 }
  0x1f   :  { %p515_p0 = por %p514_p13, %p513_p12 }
  0x21   :  { %p516_p1 = pnand %p515_p0, %p509_p11 }
  0x23   :  { %519 = shalt.err (!%p516_p1)
}
  0x24   :  { %26 = dma.hbm_to_vmem [thread:$0]  %s767_s0, 128, %s24_s16, [#allocation3]  }
  0x25   :  { %s520_s30 = scalar_lea.hbm %s770_s3, 2048 }
  0x26   :  { %p521_p2 = scmp.ne.s32.totalorder %s770_s3, %s520_s30  ;;  %p524_p3 = scmp.lt.u32.totalorder %s520_s30, %s770_s3 }
  0x28   :  { %p526_p4 = pnand %p524_p3, %p521_p2 }
  0x2a   :  { %529 = shalt.err (!%p526_p4)
}
  0x2b   :  { %s530_s14 = scalar_lea.vmem %s47_s18, 2048  ;;  %p535_p6 = scmp.lt.s32.totalorder %s47_s18, %s47_s18 }
  0x2c   :  { %p531_p5 = scmp.ne.s32.totalorder %s47_s18, %s530_s14  ;;  %p536_p7 = scmp.lt.s32.totalorder %s530_s14, %s530_s14 }
  0x2e   :  { %p537_p8 = por %p536_p7, %p535_p6 }
  0x30   :  { %p538_p9 = pnand %p537_p8, %p531_p5 }
  0x32   :  { %541 = shalt.err (!%p538_p9)
}
  0x33   :  { %52 = dma.hbm_to_vmem [thread:$0]  %s770_s3, 2048, %s47_s18, [#allocation6], %s617_s11, %s617_s11, %s618_s12  }
  0x34   :  { %608 = dma.done.wait [#allocation3], 128  }
  0x35   :  { %609 = vsyncadd [#allocation3], 4294967168 }
  0x36   :  { %610 = dma.done.wait [#allocation6], 4096  }
  0x37   :  { %611 = vsyncadd [#allocation6], 4294963200  ;;  %v621_v0 = vmov 0.0|0.0   ;;  %vm622_vm0 = vmmov 0   ;;  %v623_v1 = vmov 0.0   ;;  %v65_v2 = vld [vmem:[#allocation5] sm:$0xff] }
  0x38   :  { %413 = vmatprep.subr.bf16.mxu0 %v621_v0  ;;  %375 = vmatprep.mubr.msk.f32.mxu0 %vm622_vm0, %v623_v1  ;;  %v66_v3 = vld [vmem:[#allocation5 + $0x8] sm:$0xff]  ;;  %v67_v4 = vld [vmem:[#allocation5 + $0x10] sm:$0xff]  ;;  %v68_v6 = vld [vmem:[#allocation5 + $0x18] sm:$0xff]  ;;  %s624_s12 = smov [#allocation8]  }
  0x39   :  { %437 = vmatprep.subr.bf16.mxu1 %v621_v0  ;;  %410 = vmatprep.mubr.msk.f32.mxu1 %vm622_vm0, %v623_v1  ;;  %v414_v5 = vpack.c.bf16 %v66_v3, %v65_v2  ;;  %v417_v7 = vpack.c.bf16 %v68_v6, %v67_v4  ;;  %v69_v8 = vld [vmem:[#allocation5 + $0x20] sm:$0xff]  ;;  %v70_v9 = vld [vmem:[#allocation5 + $0x28] sm:$0xff]  ;;  %v164_v12 = vld [vmem:[#allocation7 + $0x10] sm:$0xff]  ;;  %s269_s16 = sshll.u32 %s624_s12, 4  ;;  %s270_s16 = int_to_ptr.vmem [resolvable:$true] %s269_s16 }
  0x3a   :  { %v162_v10 = vld [vmem:[#allocation7] sm:$0xff]  ;;  %v163_v11 = vld [vmem:[#allocation7 + $0x8] sm:$0xff]  ;;  %v165_v13 = vld [vmem:[#allocation7 + $0x18] sm:$0xff]  ;;  %v420_v14 = vpack.c.bf16 %v70_v9, %v69_v8  ;;  %s542_s17 = scalar_lea.vmem %s270_s16, 128  ;;  %p547_p11 = scmp.lt.s32.totalorder %s270_s16, %s270_s16 }
  0x3b   :  { %415 = vmatpush3.bf16.msra.mxu0 %v414_v5  ;;  %v438_v15 = vpack.c.bf16 %v163_v11, %v162_v10  ;;  %v71_v16 = vld [vmem:[#allocation5 + $0x30] sm:$0xff]  ;;  %v72_v17 = vld [vmem:[#allocation5 + $0x38] sm:$0xff]  ;;  %v441_v18 = vpack.c.bf16 %v165_v13, %v164_v12  ;;  %v166_v19 = vld [vmem:[#allocation7 + $0x20] sm:$0xff]  ;;  %p543_p10 = scmp.ne.s32.totalorder %s270_s16, %s542_s17  ;;  %p548_p12 = scmp.lt.s32.totalorder %s542_s17, %s542_s17 }
  0x3c   :  { %416 = vmatprep.subr.bf16.mxu0 %v621_v0  ;;  %v167_v20 = vld [vmem:[#allocation7 + $0x28] sm:$0xff]  ;;  %v423_v21 = vpack.c.bf16 %v72_v17, %v71_v16  ;;  %v73_v22 = vld [vmem:[#allocation5 + $0x40] sm:$0xff]  ;;  %v168_v25 = vld [vmem:[#allocation7 + $0x30] sm:$0xff] }
  0x3d   :  { %439 = vmatpush3.bf16.msra.mxu1 %v438_v15  ;;  %v74_v23 = vld [vmem:[#allocation5 + $0x48] sm:$0xff]  ;;  %v444_v24 = vpack.c.bf16 %v167_v20, %v166_v19  ;;  %v169_v26 = vld [vmem:[#allocation7 + $0x38] sm:$0xff]  ;;  %v75_v28 = vld [vmem:[#allocation5 + $0x50] sm:$0xff]  ;;  %p549_p13 = por %p548_p12, %p547_p11 }
  0x3e   :  { %440 = vmatprep.subr.bf16.mxu1 %v621_v0  ;;  %v426_v27 = vpack.c.bf16 %v74_v23, %v73_v22  ;;  %v76_v29 = vld [vmem:[#allocation5 + $0x58] sm:$0xff]  ;;  %v447_v30 = vpack.c.bf16 %v169_v26, %v168_v25  ;;  %v170_v31 = vld [vmem:[#allocation7 + $0x40] sm:$0xff]  ;;  %v171_v32 = vld [vmem:[#allocation7 + $0x48] sm:$0xff] }
  0x3f   :  { %418 = vmatpush3.bf16.msra.mxu0 %v417_v7  ;;  %v429_v33 = vpack.c.bf16 %v76_v29, %v75_v28  ;;  %v77_v34 = vld [vmem:[#allocation5 + $0x60] sm:$0xff]  ;;  %v78_v35 = vld [vmem:[#allocation5 + $0x68] sm:$0xff]  ;;  %v450_v36 = vpack.c.bf16 %v171_v32, %v170_v31  ;;  %v172_v37 = vld [vmem:[#allocation7 + $0x50] sm:$0xff]  ;;  %p550_p0 = pnand %p549_p13, %p543_p10 }
  0x40   :  { %419 = vmatprep.subr.bf16.mxu0 %v621_v0  ;;  %v173_v38 = vld [vmem:[#allocation7 + $0x58] sm:$0xff]  ;;  %v432_v39 = vpack.c.bf16 %v78_v35, %v77_v34  ;;  %v79_v40 = vld [vmem:[#allocation5 + $0x70] sm:$0xff]  ;;  %v174_v43 = vld [vmem:[#allocation7 + $0x60] sm:$0xff] }
  0x41   :  { %442 = vmatpush3.bf16.msra.mxu1 %v441_v18  ;;  %v80_v41 = vld [vmem:[#allocation5 + $0x78] sm:$0xff]  ;;  %v453_v42 = vpack.c.bf16 %v173_v38, %v172_v37  ;;  %v175_v44 = vld [vmem:[#allocation7 + $0x68] sm:$0xff]  ;;  %v176_v48 = vld [vmem:[#allocation7 + $0x70] sm:$0xff] }
  0x42   :  { %443 = vmatprep.subr.bf16.mxu1 %v621_v0  ;;  %v435_v45 = vpack.c.bf16 %v80_v41, %v79_v40  ;;  %v456_v46 = vpack.c.bf16 %v175_v44, %v174_v43  ;;  %v64_v47 = vld [vmem:[#allocation2] sm:$0xff] }
  0x43   :  { %421 = vmatpush3.bf16.msra.mxu0 %v420_v14  ;;  %v177_v49 = vld [vmem:[#allocation7 + $0x78] sm:$0xff] }
  0x44   :  { %422 = vmatprep.subr.bf16.mxu0 %v621_v0  ;;  %v459_v50 = vpack.c.bf16 %v177_v49, %v176_v48  ;;  %v306_v51 = vld [vmem:[%s769_s2] ss:$0 sm:$0xff] }
  0x45   :  { %445 = vmatpush3.bf16.msra.mxu1 %v444_v24 }
  0x46   :  { %446 = vmatprep.subr.bf16.mxu1 %v621_v0 }
  0x47   :  { %424 = vmatpush3.bf16.msra.mxu0 %v423_v21 }
  0x48   :  { %425 = vmatprep.subr.bf16.mxu0 %v621_v0 }
  0x49   :  { %448 = vmatpush3.bf16.msra.mxu1 %v447_v30 }
  0x4a   :  { %449 = vmatprep.subr.bf16.mxu1 %v621_v0 }
  0x4b   :  { %427 = vmatpush3.bf16.msra.mxu0 %v426_v27 }
  0x4c   :  { %428 = vmatprep.subr.bf16.mxu0 %v621_v0 }
  0x4d   :  { %451 = vmatpush3.bf16.msra.mxu1 %v450_v36 }
  0x4e   :  { %452 = vmatprep.subr.bf16.mxu1 %v621_v0 }
  0x4f   :  { %430 = vmatpush3.bf16.msra.mxu0 %v429_v33 }
  0x50   :  { %431 = vmatprep.subr.bf16.mxu0 %v621_v0 }
  0x51   :  { %454 = vmatpush3.bf16.msra.mxu1 %v453_v42 }
  0x52   :  { %455 = vmatprep.subr.bf16.mxu1 %v621_v0 }
  0x53   :  { %433 = vmatpush3.bf16.msra.mxu0 %v432_v39 }
  0x54   :  { %434 = vmatprep.subr.bf16.mxu0 %v621_v0 }
  0x55   :  { %457 = vmatpush3.bf16.msra.mxu1 %v456_v46 }
  0x56   :  { %458 = vmatprep.subr.bf16.mxu1 %v621_v0 }
  0x57   :  { %436 = vmatpush3.bf16.msra.mxu0 %v435_v45 }
  0x59   :  { %460 = vmatpush3.bf16.msra.mxu1 %v459_v50 }
  0x5a   :  { %376 = vmatmul.mubr.f32.vlgmr.msra.gmra.mrb[0].mxu0 %v64_v47 }
 0x12d   :  { %v154_v52 = vpop.f32.mrb[0].mxu0 }
 0x12e   :  { %v155_v53 = vadd.f32 %v306_v51, %v154_v52  ;;  %v377_v54 = vpop.f32.mrb[1].mxu0 }
 0x130   :  { %v159_v55 = vmul.f32 0.2, %v155_v53  ;;  %vm158_vm1 = vcmp.gt.f32.partialorder %v155_v53, 0.0 }
 0x132   :  { %v160_v56 = vsel %vm158_vm1, %v155_v53, %v159_v55 }
 0x133   :  { %411 = vmatmul.mubr.f32.vlgmr.msra.gmra.mrb[0].mxu1 %v160_v56  ;;  %161 = vst [vmem:[#allocation8] sm:$0xff] %v160_v56 }
 0x134   :  { %553 = shalt.err (!%p550_p0)
}
 0x135   :  { %s554_s19 = scalar_lea.hbm %s772_s5, 128 }
 0x136   :  { %p555_p1 = scmp.ne.s32.totalorder %s772_s5, %s554_s19  ;;  %p558_p2 = scmp.lt.u32.totalorder %s554_s19, %s772_s5 }
 0x138   :  { %p560_p3 = pnand %p558_p2, %p555_p1 }
 0x13a   :  { %563 = shalt.err (!%p560_p3)
}
 0x13b   :  { %272 = dma.vmem_to_hbm [thread:$0]  %s270_s16, 128, %s772_s5, [#allocation4]   ;;  %v307_v57 = vld [vmem:[%s771_s4] ss:$0 sm:$0xff] }
 0x13c   :  { %s625_s27 = smov [#allocation9]  }
 0x13d   :  { %s279_s28 = sshll.u32 %s625_s27, 4  ;;  %s280_s28 = int_to_ptr.vmem [resolvable:$true] %s279_s28 }
 0x13e   :  { %s564_s29 = scalar_lea.vmem %s280_s28, 128  ;;  %p569_p5 = scmp.lt.s32.totalorder %s280_s28, %s280_s28 }
 0x13f   :  { %p565_p4 = scmp.ne.s32.totalorder %s280_s28, %s564_s29  ;;  %p570_p6 = scmp.lt.s32.totalorder %s564_s29, %s564_s29 }
 0x141   :  { %p571_p7 = por %p570_p6, %p569_p5 }
 0x143   :  { %p572_p8 = pnand %p571_p7, %p565_p4 }
 0x206   :  { %v251_v58 = vpop.f32.mrb[0].mxu1 }
 0x207   :  { %v252_v59 = vadd.f32 %v307_v57, %v251_v58  ;;  %v412_v60 = vpop.f32.mrb[1].mxu1 }
 0x209   :  { %v308_v61 = vmul.f32 -1.442695, %v252_v59  ;;  %255 = vst [vmem:[#allocation9] sm:$0xff] %v252_v59 }
 0x20a   :  { %575 = shalt.err (!%p572_p8)
}
 0x20b   :  { %s576_s8 = scalar_lea.hbm %s773_s6, 128 }
 0x20c   :  { %p577_p9 = scmp.ne.s32.totalorder %s773_s6, %s576_s8  ;;  %p580_p10 = scmp.lt.u32.totalorder %s576_s8, %s773_s6 }
 0x20e   :  { %p582_p11 = pnand %p580_p10, %p577_p9 }
 0x210   :  { %585 = shalt.err (!%p582_p11)
}
 0x211   :  { %282 = dma.vmem_to_hbm [thread:$0]  %s280_s28, 128, %s773_s6, [#allocation10]   ;;  %472 = vpow2.f32 %v308_v61 }
 0x212   :  { %s626_s15 = smov [#allocation11]  }
 0x213   :  { %s289_s3 = sshll.u32 %s626_s15, 4  ;;  %s290_s3 = int_to_ptr.vmem [resolvable:$true] %s289_s3 }
 0x214   :  { %s586_s11 = scalar_lea.vmem %s290_s3, 128  ;;  %p591_p13 = scmp.lt.s32.totalorder %s290_s3, %s290_s3 }
 0x215   :  { %p587_p12 = scmp.ne.s32.totalorder %s290_s3, %s586_s11  ;;  %p592_p0 = scmp.lt.s32.totalorder %s586_s11, %s586_s11 }
 0x217   :  { %p593_p1 = por %p592_p0, %p591_p13 }
 0x219   :  { %p594_p2 = pnand %p593_p1, %p587_p12 }
 0x21b   :  { %v473_v62 = vpop.eup %472 }
 0x21c   :  { %v259_v63 = vadd.f32 1.0, %v473_v62 }
 0x21e   :  { %474 = vrcp.f32 %v259_v63 }
 0x228   :  { %v475_v0 = vpop.eup %474 }
 0x229   :  { %262 = vst [vmem:[#allocation11] sm:$0xff] %v475_v0 }
 0x22a   :  { %597 = shalt.err (!%p594_p2)
}
 0x22b   :  { %s598_s6 = scalar_lea.hbm %s774_s7, 128 }
 0x22c   :  { %p599_p3 = scmp.ne.s32.totalorder %s774_s7, %s598_s6  ;;  %p602_p4 = scmp.lt.u32.totalorder %s598_s6, %s774_s7 }
 0x22e   :  { %p604_p5 = pnand %p602_p4, %p599_p3 }
 0x230   :  { %607 = shalt.err (!%p604_p5)
}
 0x231   :  { %292 = dma.vmem_to_hbm [thread:$0]  %s290_s3, 128, %s774_s7, [#allocation10]  }
 0x232   :  { %612 = dma.done.wait [#allocation4], 128  }
 0x233   :  { %613 = vsyncadd [#allocation4], 4294967168 }
 0x234   :  { %614 = dma.done.wait [#allocation10], 256  }
 0x235   :  { %615 = vsyncadd [#allocation10], 4294967040 }
 0x236   :  { %302 = vsyncpa [#allocation3], 1 }
 0x237   :  { %303 = vsyncpa [#allocation6], 1 }
 0x238   :  { %304 = vsyncpa [#allocation4], 1 }
 0x239   :  { %305 = vsyncpa [#allocation10], 1 }

</bundles_post_ra>
